<compile_context>
chip_gen: v6e
topology: v6e:2x2x1
jax: 0.10.0
libtpu: 0.0.40
codegen_flags: <defaults>
</compile_context>

<pallas_src>
import functools

import numpy as np
import jax
import jax.numpy as jnp
from jax.experimental import pallas as pl
from jax.experimental.pallas import tpu as pltpu

DROPOUT_P = 0.7
KEEP_P = 1.0 - DROPOUT_P

# Python/numpy scalars ONLY (they become jaxpr literals; jnp scalars would be
# captured constants and break kernel tracing).
_KEEP_THRESHOLD = np.uint32(int(KEEP_P * (1 << 32)))   # P(u32 < thr) == KEEP_P
_INV_KEEP = np.float32(1.0 / KEEP_P)
_C_ROW = np.uint32(0x9E3779B1)
_C_COL = np.uint32(0x85EBCA77)
_M1 = np.uint32(0x85EBCA6B)
_M2 = np.uint32(0xC2B2AE35)
_SEED_MIX = np.int32(40503)


def _dropout_keep(seed_ref, tile_rows, shape):
    """In-kernel keep-mask for the current batch tile (no HBM bits stream)."""
    row0 = pl.program_id(0) * tile_rows            # global row offset of tile
    s = seed_ref[0]                                # int32 scalar from SMEM
    r_i = jax.lax.broadcasted_iota(jnp.int32, shape, 0) + row0 + s * _SEED_MIX
    c_i = jax.lax.broadcasted_iota(jnp.int32, shape, 1) + s
    z = (r_i.astype(jnp.uint32) * _C_ROW) ^ (c_i.astype(jnp.uint32) * _C_COL)
    z = (z ^ (z >> 16)) * _M1                      # murmur3 fmix32 avalanche
    z = (z ^ (z >> 13)) * _M2
    z = z ^ (z >> 16)
    return z < _KEEP_THRESHOLD


def _forward_tile(x_ref, w1_ref, b1_ref, w2_ref, b2_ref, h_ref, y_ref, *,
                  seed_ref, tile_rows, compute_dtype):
    cast = lambda v: v if v.dtype == compute_dtype else v.astype(compute_dtype)

    # fc: x @ W1 + b1, ReLU.  f32 accumulation on the MXU.
    x = cast(x_ref[...])
    h = jnp.dot(x, cast(w1_ref[...]), preferred_element_type=jnp.float32)
    h = jnp.maximum(h + b1_ref[...].astype(jnp.float32), 0.0)

    if seed_ref is not None:                       # training: dropout(p=0.7)
        keep = _dropout_keep(seed_ref, tile_rows, h.shape)
        h = jnp.where(keep, h * _INV_KEEP, 0.0)

    # NOTE: for small n_feature (<128) this store is lane-masked; accepted and
    # compensated by the large batch tile (see perf review).
    h_ref[...] = h.astype(h_ref.dtype)

    # classifier: fed from the in-register f32 h (identical to the stored h at
    # matching dtypes; avoids a down/up-cast round trip when storing bf16).
    y = jnp.dot(cast(h), cast(w2_ref[...]), preferred_element_type=jnp.float32)
    y_ref[...] = (y + b2_ref[...].astype(jnp.float32)).astype(y_ref.dtype)


def _train_kernel(seed_ref, x_ref, w1_ref, b1_ref, w2_ref, b2_ref, h_ref, y_ref,
                  *, tile_rows, compute_dtype):
    _forward_tile(x_ref, w1_ref, b1_ref, w2_ref, b2_ref, h_ref, y_ref,
                  seed_ref=seed_ref, tile_rows=tile_rows,
                  compute_dtype=compute_dtype)


def _eval_kernel(x_ref, w1_ref, b1_ref, w2_ref, b2_ref, h_ref, y_ref, *,
                 compute_dtype):
    _forward_tile(x_ref, w1_ref, b1_ref, w2_ref, b2_ref, h_ref, y_ref,
                  seed_ref=None, tile_rows=0, compute_dtype=compute_dtype)


def _vmem_limit_bytes():
    # Generation-aware VMEM budget with headroom: never the full 64 MiB on
    # v7x, and no needless 64 MiB cap on 128 MiB v5e/v6e parts.
    try:
        cap = int(pltpu.get_tpu_info().vmem_capacity_bytes)
    except Exception:
        cap = 64 * 1024 * 1024
    return (cap * 3) // 4


@functools.partial(jax.jit, static_argnames=("is_training", "compute_dtype", "block_m"))
def model_forward(x, w1, b1, w2, b2, dropout_key=None, *, is_training=True,
                  compute_dtype=jnp.float32, block_m=4096):
    """x: [B, F]. PyTorch-layout params: w1 [F, F], b1 [F], w2 [C, F], b2 [C].

    Returns (h, logits) exactly like Model.forward.
    """
    B, F = x.shape
    C = w2.shape[0]

    # Pre-transpose once: [out, in] -> [in, out] (canonical MXU feed).
    w1_t = w1.T                                   # [F, F]
    w2_t = w2.T                                   # [F, C]
    b1_2d = b1.reshape(1, F)

    # Lane-dense classifier output: pad C up to a multiple of 128 so the
    # logits stores/DMAs are unmasked full-lane writes; slice back outside.
    Cp = max(128, ((C + 127) // 128) * 128)
    if Cp != C:
        w2_t = jnp.pad(w2_t, ((0, 0), (0, Cp - C)))
        b2_2d = jnp.pad(b2, (0, Cp - C)).reshape(1, Cp)
    else:
        b2_2d = b2.reshape(1, Cp)

    # Batch tiling: big tiles amortize per-grid-step overhead; keep >=2
    # parallel steps for very large batches so both v7x TensorCores get work.
    tm = B if B <= block_m else block_m
    if tm == B and B >= 2048 and (B // 2) % 8 == 0:
        tm = B // 2
    grid = (pl.cdiv(B, tm),)

    if is_training:
        if dropout_key is None:
            dropout_key = jax.random.PRNGKey(0)
        seed = jax.random.randint(dropout_key, (1,), 0,
                                  jnp.iinfo(jnp.int32).max, dtype=jnp.int32)
        num_prefetch = 1
        tile = lambda cols: pl.BlockSpec((tm, cols), lambda i, seed_ref: (i, 0))
        pinned = lambda shape: pl.BlockSpec(shape, lambda i, seed_ref: (0, 0))
        kernel = functools.partial(_train_kernel, tile_rows=tm,
                                   compute_dtype=compute_dtype)
        prefetch_args = (seed,)
    else:
        num_prefetch = 0
        tile = lambda cols: pl.BlockSpec((tm, cols), lambda i: (i, 0))
        pinned = lambda shape: pl.BlockSpec(shape, lambda i: (0, 0))
        kernel = functools.partial(_eval_kernel, compute_dtype=compute_dtype)
        prefetch_args = ()

    # Weights/biases stay pinned VMEM-resident (constant block index); at
    # large F consider single-buffering them (pipeline_mode) / K-tiling (TODO above).
    in_specs = [tile(F), pinned((F, F)), pinned((1, F)),
                pinned((F, Cp)), pinned((1, Cp))]
    out_specs = (tile(F), tile(Cp))

    grid_spec = pltpu.PrefetchScalarGridSpec(
        num_scalar_prefetch=num_prefetch,
        grid=grid,
        in_specs=in_specs,
        out_specs=out_specs,
    )

    h, y_full = pl.pallas_call(
        kernel,
        grid_spec=grid_spec,
        out_shape=(jax.ShapeDtypeStruct((B, F), x.dtype),
                   jax.ShapeDtypeStruct((B, Cp), x.dtype)),
        compiler_params=pltpu.CompilerParams(
            dimension_semantics=("parallel",),      # shard batch tiles across TCs
            vmem_limit_bytes=_vmem_limit_bytes(),
        ),
    )(*prefetch_args, x, w1_t, b1_2d, w2_t, b2_2d)

    logits = y_full[:, :C] if Cp != C else y_full
    return h, logits


def init_params(key, n_feature, n_class):
    # Deterministic init mimicking nn.Linear's uniform(-1/sqrt(fan_in), +).
    k1, k2, k3, k4 = jax.random.split(key, 4)
    bound = 1.0 / (n_feature ** 0.5)
    w1 = jax.random.uniform(k1, (n_feature, n_feature), jnp.float32, -bound, bound)
    b1 = jax.random.uniform(k2, (n_feature,), jnp.float32, -bound, bound)
    w2 = jax.random.uniform(k3, (n_class, n_feature), jnp.float32, -bound, bound)
    b2 = jax.random.uniform(k4, (n_class,), jnp.float32, -bound, bound)
    return w1, b1, w2, b2


if __name__ == "__main__":
    key = jax.random.PRNGKey(0)
    kx, kp, kd = jax.random.split(key, 3)

    batch, n_feature, n_class = 8, 32, 8
    x = jax.random.normal(kx, (batch, n_feature), dtype=jnp.float32)
    w1, b1, w2, b2 = init_params(kp, n_feature, n_class)

    # training path (in-kernel dropout RNG seeded from the provided key)
    h_train, y_train = model_forward(x, w1, b1, w2, b2, kd, is_training=True)
    # eval path (no dropout)
    h_eval, y_eval = model_forward(x, w1, b1, w2, b2, is_training=False)
    jax.block_until_ready((h_train, y_train, h_eval, y_eval))

    # eval path vs pure-JAX reference
    h_expected = jnp.maximum(x @ w1.T + b1, 0.0)
    y_expected = h_expected @ w2.T + b2
    assert jnp.allclose(h_eval, h_expected, atol=1e-5)
    assert jnp.allclose(y_eval, y_expected, atol=1e-5)

    # training path consistency: survivors scaled by 1/(1-p), zeros elsewhere,
    # and logits == classifier(post-dropout h).
    kept = h_train != 0.0
    assert jnp.allclose(jnp.where(kept, h_train, 0.0),
                        jnp.where(kept, h_expected * (1.0 / KEEP_P), 0.0),
                        atol=1e-4)
    assert jnp.allclose(y_train, h_train @ w2.T + b2, atol=1e-4)

    # dropout actually drops and keeps something (very loose statistical bound)
    pos = np.asarray(h_expected > 0)
    kept_np = np.asarray(kept)
    if pos.any():
        frac = kept_np[pos].mean()
        assert 0.02 < frac < 0.90, f"suspicious dropout keep fraction: {frac}"

    # bf16 compute path (recommended on v6e/v7x at scale) -- loose tolerance
    h_bf, y_bf = model_forward(x, w1, b1, w2, b2, is_training=False,
                               compute_dtype=jnp.bfloat16)
    jax.block_until_ready((h_bf, y_bf))
    assert jnp.allclose(h_bf, h_expected, atol=0.1, rtol=0.1)

    print("KERNEL_OK")
</pallas_src>

<mosaic_0001>
module attributes {stable_mosaic.version = 11 : i64} {
  func.func @_train_kernel(%arg0: i32, %arg1: memref<1xi32, #tpu.memory_space<smem>>, %arg2: memref<8x32xf32, #tpu.memory_space<vmem>>, %arg3: memref<32x32xf32, #tpu.memory_space<vmem>>, %arg4: memref<1x32xf32, #tpu.memory_space<vmem>>, %arg5: memref<32x128xf32, #tpu.memory_space<vmem>>, %arg6: memref<1x128xf32, #tpu.memory_space<vmem>>, %arg7: memref<8x32xf32, #tpu.memory_space<vmem>>, %arg8: memref<8x128xf32, #tpu.memory_space<vmem>>) attributes {dimension_semantics = [#tpu.dimension_semantics<parallel>], iteration_bounds = array<i64: 1>, scalar_prefetch = 1 : i64, scratch_operands = 0 : i64, tpu.core_type = #tpu.core_type<tc>, window_params = [{transform_indices = @transform_0, window_bounds = array<i64: 8, 32>}, {pipeline_mode = #tpu.pipeline_mode<synchronous>, transform_indices = @transform_1, window_bounds = array<i64: 32, 32>}, {pipeline_mode = #tpu.pipeline_mode<synchronous>, transform_indices = @transform_2, window_bounds = array<i64: 1, 32>}, {pipeline_mode = #tpu.pipeline_mode<synchronous>, transform_indices = @transform_3, window_bounds = array<i64: 32, 128>}, {pipeline_mode = #tpu.pipeline_mode<synchronous>, transform_indices = @transform_4, window_bounds = array<i64: 1, 128>}, {transform_indices = @transform_5, window_bounds = array<i64: 8, 32>}, {transform_indices = @transform_6, window_bounds = array<i64: 8, 128>}]} {
    %c0 = arith.constant 0 : index
    %c0_0 = arith.constant 0 : index
    %0 = vector.load %arg2[%c0, %c0_0] : memref<8x32xf32, #tpu.memory_space<vmem>>, vector<8x32xf32>
    %c0_1 = arith.constant 0 : index
    %c0_2 = arith.constant 0 : index
    %1 = vector.load %arg3[%c0_1, %c0_2] : memref<32x32xf32, #tpu.memory_space<vmem>>, vector<32x32xf32>
    %cst = arith.constant dense<0.000000e+00> : vector<8x32xf32>
    %2 = tpu.matmul %0, %1, %cst {dimension_numbers = #tpu.dot_dimension_numbers<[1], [0], [0], [1], [0, 0, 1, 1], [], []>} : vector<8x32xf32>, vector<32x32xf32>, vector<8x32xf32> -> vector<8x32xf32>
    %c0_3 = arith.constant 0 : index
    %c0_4 = arith.constant 0 : index
    %3 = vector.load %arg4[%c0_3, %c0_4] : memref<1x32xf32, #tpu.memory_space<vmem>>, vector<1x32xf32>
    %4 = vector.broadcast %3 : vector<1x32xf32> to vector<8x32xf32>
    %5 = arith.addf %2, %4 : vector<8x32xf32>
    %cst_5 = arith.constant 0.000000e+00 : f32
    %6 = vector.broadcast %cst_5 : f32 to vector<8x32xf32>
    %7 = arith.maximumf %5, %6 : vector<8x32xf32>
    %c8_i32 = arith.constant 8 : i32
    %8 = arith.muli %arg0, %c8_i32 : i32
    %c0_6 = arith.constant 0 : index
    %9 = memref.load %arg1[%c0_6] : memref<1xi32, #tpu.memory_space<smem>>
    %10 = tpu.iota {dimensions = array<i32: 0>} : vector<8x32xi32>
    %11 = vector.broadcast %8 : i32 to vector<8x32xi32>
    %12 = arith.addi %10, %11 : vector<8x32xi32>
    %c40503_i32 = arith.constant 40503 : i32
    %13 = arith.muli %9, %c40503_i32 : i32
    %14 = vector.broadcast %13 : i32 to vector<8x32xi32>
    %15 = arith.addi %12, %14 : vector<8x32xi32>
    %16 = tpu.iota {dimensions = array<i32: 1>} : vector<8x32xi32>
    %17 = vector.broadcast %9 : i32 to vector<8x32xi32>
    %18 = arith.addi %16, %17 : vector<8x32xi32>
    %c-1640531535_i32 = arith.constant -1640531535 : i32
    %19 = vector.broadcast %c-1640531535_i32 : i32 to vector<8x32xi32>
    %20 = arith.muli %15, %19 : vector<8x32xi32>
    %c-2048144777_i32 = arith.constant -2048144777 : i32
    %21 = vector.broadcast %c-2048144777_i32 : i32 to vector<8x32xi32>
    %22 = arith.muli %18, %21 : vector<8x32xi32>
    %23 = arith.xori %20, %22 : vector<8x32xi32>
    %c16_i32 = arith.constant 16 : i32
    %24 = vector.broadcast %c16_i32 : i32 to vector<8x32xi32>
    %25 = arith.shrui %23, %24 : vector<8x32xi32>
    %26 = arith.xori %23, %25 : vector<8x32xi32>
    %c-2048144789_i32 = arith.constant -2048144789 : i32
    %27 = vector.broadcast %c-2048144789_i32 : i32 to vector<8x32xi32>
    %28 = arith.muli %26, %27 : vector<8x32xi32>
    %c13_i32 = arith.constant 13 : i32
    %29 = vector.broadcast %c13_i32 : i32 to vector<8x32xi32>
    %30 = arith.shrui %28, %29 : vector<8x32xi32>
    %31 = arith.xori %28, %30 : vector<8x32xi32>
    %c-1028477387_i32 = arith.constant -1028477387 : i32
    %32 = vector.broadcast %c-1028477387_i32 : i32 to vector<8x32xi32>
    %33 = arith.muli %31, %32 : vector<8x32xi32>
    %c16_i32_7 = arith.constant 16 : i32
    %34 = vector.broadcast %c16_i32_7 : i32 to vector<8x32xi32>
    %35 = arith.shrui %33, %34 : vector<8x32xi32>
    %36 = arith.xori %33, %35 : vector<8x32xi32>
    %c1288490188_i32 = arith.constant 1288490188 : i32
    %37 = vector.broadcast %c1288490188_i32 : i32 to vector<8x32xi32>
    %38 = arith.cmpi ult, %36, %37 : vector<8x32xi32>
    %cst_8 = arith.constant 3.33333325 : f32
    %39 = vector.broadcast %cst_8 : f32 to vector<8x32xf32>
    %40 = arith.mulf %7, %39 : vector<8x32xf32>
    %cst_9 = arith.constant 0.000000e+00 : f32
    %41 = vector.broadcast %cst_9 : f32 to vector<8x32xf32>
    %42 = arith.select %38, %40, %41 : vector<8x32xi1>, vector<8x32xf32>
    %c0_10 = arith.constant 0 : index
    %c0_11 = arith.constant 0 : index
    %43 = vector.load %arg7[%c0_10, %c0_11] : memref<8x32xf32, #tpu.memory_space<vmem>>, vector<8x32xf32>
    tpu.vector_store %arg7[%c0_10, %c0_11], %42 {strides = array<i32>} : memref<8x32xf32, #tpu.memory_space<vmem>>, vector<8x32xf32>,
    %c0_12 = arith.constant 0 : index
    %c0_13 = arith.constant 0 : index
    %44 = vector.load %arg5[%c0_12, %c0_13] : memref<32x128xf32, #tpu.memory_space<vmem>>, vector<32x128xf32>
    %cst_14 = arith.constant dense<0.000000e+00> : vector<8x128xf32>
    %45 = tpu.matmul %42, %44, %cst_14 {dimension_numbers = #tpu.dot_dimension_numbers<[1], [0], [0], [1], [0, 0, 1, 1], [], []>} : vector<8x32xf32>, vector<32x128xf32>, vector<8x128xf32> -> vector<8x128xf32>
    %c0_15 = arith.constant 0 : index
    %c0_16 = arith.constant 0 : index
    %46 = vector.load %arg6[%c0_15, %c0_16] : memref<1x128xf32, #tpu.memory_space<vmem>>, vector<1x128xf32>
    %47 = vector.broadcast %46 : vector<1x128xf32> to vector<8x128xf32>
    %48 = arith.addf %45, %47 : vector<8x128xf32>
    %c0_17 = arith.constant 0 : index
    %c0_18 = arith.constant 0 : index
    %49 = vector.load %arg8[%c0_17, %c0_18] : memref<8x128xf32, #tpu.memory_space<vmem>>, vector<8x128xf32>
    tpu.vector_store %arg8[%c0_17, %c0_18], %48 {strides = array<i32>} : memref<8x128xf32, #tpu.memory_space<vmem>>, vector<8x128xf32>,
    return
  }
  func.func @transform_0(%arg0: i32, %arg1: memref<1xi32, #tpu.memory_space<smem>>) -> (i32, i32) {
    %c0_i32 = arith.constant 0 : i32
    %c0_i32_0 = arith.constant 0 : i32
    return %arg0, %c0_i32 : i32, i32
  }
  func.func @transform_1(%arg0: i32, %arg1: memref<1xi32, #tpu.memory_space<smem>>) -> (i32, i32) {
    %c0_i32 = arith.constant 0 : i32
    %c0_i32_0 = arith.constant 0 : i32
    %c0_i32_1 = arith.constant 0 : i32
    return %c0_i32, %c0_i32_0 : i32, i32
  }
  func.func @transform_2(%arg0: i32, %arg1: memref<1xi32, #tpu.memory_space<smem>>) -> (i32, i32) {
    %c0_i32 = arith.constant 0 : i32
    %c0_i32_0 = arith.constant 0 : i32
    %c0_i32_1 = arith.constant 0 : i32
    return %c0_i32, %c0_i32_0 : i32, i32
  }
  func.func @transform_3(%arg0: i32, %arg1: memref<1xi32, #tpu.memory_space<smem>>) -> (i32, i32) {
    %c0_i32 = arith.constant 0 : i32
    %c0_i32_0 = arith.constant 0 : i32
    %c0_i32_1 = arith.constant 0 : i32
    return %c0_i32, %c0_i32_0 : i32, i32
  }
  func.func @transform_4(%arg0: i32, %arg1: memref<1xi32, #tpu.memory_space<smem>>) -> (i32, i32) {
    %c0_i32 = arith.constant 0 : i32
    %c0_i32_0 = arith.constant 0 : i32
    %c0_i32_1 = arith.constant 0 : i32
    return %c0_i32, %c0_i32_0 : i32, i32
  }
  func.func @transform_5(%arg0: i32, %arg1: memref<1xi32, #tpu.memory_space<smem>>) -> (i32, i32) {
    %c0_i32 = arith.constant 0 : i32
    %c0_i32_0 = arith.constant 0 : i32
    return %arg0, %c0_i32 : i32, i32
  }
  func.func @transform_6(%arg0: i32, %arg1: memref<1xi32, #tpu.memory_space<smem>>) -> (i32, i32) {
    %c0_i32 = arith.constant 0 : i32
    %c0_i32_0 = arith.constant 0 : i32
    return %arg0, %c0_i32 : i32, i32
  }
}

</mosaic_0001>

<bundles_post_ra>
// kernel: model_forward.1
= control target key start
LH: loop header
LB: loop body
LE: loop exit
PB: predicated region body
PF: predicated region fallthrough
CT: control target
= control target key end

     0   :  { %14 = vsyncpa [#allocation5], 0  ;;  %v338_v1 = vmov 0.0   ;;  %vm339_vm0 = vmmov 0   ;;  %s430_s0 = inlined_call_operand.<no memory space> [shape: s32[1], index: 0, kind: input, shape index: {}]   ;;  %s431_s1 = inlined_call_operand.vmem [shape: f32[8,32], index: 1, kind: input, shape index: {}]   ;;  %s432_s2 = inlined_call_operand.vmem [shape: f32[32,32], index: 2, kind: input, shape index: {}]   ;;  %s433_s3 = inlined_call_operand.vmem [shape: f32[1,32], index: 3, kind: input, shape index: {}]   ;;  %s434_s4 = inlined_call_operand.vmem [shape: f32[32,128], index: 4, kind: input, shape index: {}]   ;;  %s435_s5 = inlined_call_operand.vmem [shape: f32[1,128], index: 5, kind: input, shape index: {}]   ;;  %s436_s6 = inlined_call_operand.hbm [shape: f32[8,32], index: 6, kind: output, shape index: {0}]   ;;  %s437_s7 = inlined_call_operand.hbm [shape: f32[8,128], index: 7, kind: output, shape index: {1}]  }
   0x1   :  { %v30_v0 = vld [vmem:[%s432_s2 + $0x18] sm:$0xff]  ;;  %268 = vmatprep.subr.mxu0 %v338_v1  ;;  %v29_v2 = vld [vmem:[%s432_s2 + $0x10] sm:$0xff]  ;;  %276 = vmatprep.mubr.msk.f32.mxu0 %vm339_vm0, %v338_v1 }
   0x2   :  { %269 = vmatpush3.msra.mxu0 %v30_v0  ;;  %279 = vmatprep.subr.mxu1 %v338_v1 }
   0x3   :  { %15 = vsyncpa [#allocation7], 0  ;;  %270 = vmatprep.subr.mxu0 %v338_v1  ;;  %v28_v3 = vld [vmem:[%s432_s2 + $0x8] sm:$0xff]  ;;  %287 = vmatprep.mubr.msk.f32.mxu1 %vm339_vm0, %v338_v1  ;;  %v27_v4 = vld [vmem:[%s432_s2] sm:$0xff]  ;;  %vm38_vm1 = vcmask 261120   ;;  %v115_v10 = vlaneseq  ;;  %s119_s19 = smul.u32 40503, %s430_s0  ;;  %v124_v14 = vstv %s430_s0 }
   0x4   :  { %271 = vmatpush3.msra.mxu0 %v29_v2  ;;  %v26_v5 = vld [vmem:[%s431_s1] sm:$0xff]  ;;  %v144_v6 = vld [vmem:[%s434_s4 + $0x18] sm:$0xff]  ;;  %v143_v7 = vld [vmem:[%s434_s4 + $0x10] sm:$0xff]  ;;  %s340_s0 = smov [#allocation4]  }
   0x5   :  { %272 = vmatprep.subr.mxu0 %v338_v1  ;;  %280 = vmatpush3.msra.mxu1 %v144_v6  ;;  %v142_v8 = vld [vmem:[%s434_s4 + $0x8] sm:$0xff]  ;;  %v141_v9 = vld [vmem:[%s434_s4] sm:$0xff]  ;;  %v116_v11 = vshrl.u32 %v115_v10, 7  ;;  %v123_v12 = vand.u32 127, %v115_v10  ;;  %v120_v13 = vstv %s119_s19  ;;  %s232_s23 = sshll.u32 %s340_s0, 4  ;;  %s233_s23 = int_to_ptr.vmem [resolvable:$true] %s232_s23 }
   0x6   :  { %273 = vmatpush3.msra.mxu0 %v28_v3  ;;  %281 = vmatprep.subr.mxu1 %v338_v1  ;;  %v254_v27 = vld [vmem:[%s433_s3] ss:$0 sm:$0xff]  ;;  %s294_s24 = scalar_lea.vmem %s233_s23, 128  ;;  %p299_p1 = scmp.lt.s32.totalorder %s233_s23, %s233_s23 }
   0x7   :  { %274 = vmatprep.subr.mxu0 %v338_v1  ;;  %282 = vmatpush3.msra.mxu1 %v143_v7  ;;  %v121_v15 = vadd.s32 %v120_v13, %v116_v11  ;;  %v125_v16 = vadd.s32 %v124_v14, %v123_v12  ;;  %p295_p0 = scmp.ne.s32.totalorder %s233_s23, %s294_s24  ;;  %p300_p2 = scmp.lt.s32.totalorder %s294_s24, %s294_s24 }
   0x8   :  { %275 = vmatpush3.msra.mxu0 %v27_v4  ;;  %283 = vmatprep.subr.mxu1 %v338_v1 }
   0x9   :  { %277 = vmatmul.mubr.msk.f32.vlgmr.msra.gmra.mxu0 %vm38_vm1, %v26_v5  ;;  %284 = vmatpush3.msra.mxu1 %v142_v8  ;;  %v126_v17 = vmul.u32 2654435761, %v121_v15  ;;  %v127_v18 = vmul.u32 2246822519, %v125_v16  ;;  %p301_p3 = por %p300_p2, %p299_p1 }
   0xa   :  { %285 = vmatprep.subr.mxu1 %v338_v1 }
   0xb   :  { %286 = vmatpush3.msra.mxu1 %v141_v9  ;;  %v128_v19 = vxor.u32 %v127_v18, %v126_v17  ;;  %p302_p4 = pnand %p301_p3, %p295_p0 }
   0xd   :  { %v129_v20 = vshrl.u32 %v128_v19, 16 }
   0xf   :  { %v130_v21 = vxor.u32 %v129_v20, %v128_v19 }
  0x11   :  { %v131_v22 = vmul.u32 2246822507, %v130_v21 }
  0x13   :  { %v132_v23 = vshrl.u32 %v131_v22, 13 }
  0x15   :  { %v133_v24 = vxor.u32 %v132_v23, %v131_v22 }
  0x17   :  { %v134_v25 = vmul.u32 3266489909, %v133_v24 }
  0x19   :  { %v135_v26 = vshrl.u32 %v134_v25, 16 }
  0x1b   :  { %v136_v29 = vxor.u32 %v135_v26, %v134_v25 }
  0x1d   :  { %vm137_vm2 = vcmp.lt.u32.totalorder %v136_v29, 1288490188 }
  0xc9   :  { %v108_v28 = vpop.f32.mrf.mxu0 }
  0xca   :  { %v109_v30 = vadd.f32 %v254_v27, %v108_v28 }
  0xcb   :  { %v278_v31 = vpop.f32.mrf.mxu0 }
  0xcc   :  { %v112_v32 = vmax.f32 %v109_v30, 0.0 }
  0xce   :  { %v138_v33 = vmul.f32 3.3333333, %v112_v32 }
  0xd0   :  { %v139_v34 = vsel %vm137_vm2, %v138_v33, 0.0 }
  0xd1   :  { %288 = vmatmul.mubr.msk.f32.vlgmr.msra.gmra.mxu1 %vm38_vm1, %v139_v34  ;;  %140 = vst.msk [vmem:[#allocation4] sm:$0xff] %vm38_vm1, %v139_v34 }
  0xd2   :  { %305 = shalt.err (!%p302_p4)
}
  0xd3   :  { %235 = dma.vmem_to_hbm [thread:$0]  %s233_s23, 128, %s436_s6, [#allocation5]   ;;  %v256_v35 = vld [vmem:[%s435_s5] ss:$0 sm:$0xff] }
  0xd4   :  { %s341_s28 = smov [#allocation6]  }
  0xd5   :  { %s242_s29 = sshll.u32 %s341_s28, 4  ;;  %s243_s29 = int_to_ptr.vmem [resolvable:$true] %s242_s29 }
  0xd6   :  { %s314_s30 = scalar_lea.vmem %s243_s29, 128  ;;  %p319_p6 = scmp.lt.s32.totalorder %s243_s29, %s243_s29 }
  0xd7   :  { %p315_p5 = scmp.ne.s32.totalorder %s243_s29, %s314_s30  ;;  %p320_p7 = scmp.lt.s32.totalorder %s314_s30, %s314_s30 }
  0xd9   :  { %p321_p8 = por %p320_p7, %p319_p6 }
  0xdb   :  { %p322_p9 = pnand %p321_p8, %p315_p5 }
 0x191   :  { %v221_v36 = vpop.f32.mrf.mxu1 }
 0x192   :  { %v222_v37 = vadd.f32 %v256_v35, %v221_v36 }
 0x193   :  { %v289_v38 = vpop.f32.mrf.mxu1 }
 0x194   :  { %225 = vst [vmem:[#allocation6] sm:$0xff] %v222_v37 }
 0x195   :  { %325 = shalt.err (!%p322_p9)
}
 0x196   :  { %245 = dma.vmem_to_hbm [thread:$0]  %s243_s29, 128, %s437_s7, [#allocation7]  }
 0x197   :  { %334 = dma.done.wait [#allocation5], 128  }
 0x198   :  { %335 = vsyncadd [#allocation5], 4294967168 }
 0x199   :  { %336 = dma.done.wait [#allocation7], 128  }
 0x19a   :  { %337 = vsyncadd [#allocation7], 4294967168 }
 0x19b   :  { %252 = vsyncpa [#allocation5], 1 }
 0x19c   :  { %253 = vsyncpa [#allocation7], 1 }

</bundles_post_ra>
